<compile_context>
chip_gen: v7x
topology: tpu7x:2x2x1
jax: 0.10.0
libtpu: 0.0.40
codegen_flags: <defaults>
</compile_context>

<pallas_src>
import jax
import jax.numpy as jnp
from jax.experimental import pallas as pl
from jax.experimental.pallas import tpu as pltpu

FEAT_C = 320   # EfficientNet-B0 feature channels feeding the head
HIDDEN = 256


def _round_up(x, m):
    return ((x + m - 1) // m) * m


def head_kernel(x_ref, w1_ref, b1_ref, w2_ref, b2_ref, out_ref):
    # x_ref : (TB, HW, C)  feature-map tile, channels-last (native dtype)
    # w1_ref: (C, 256) f32,  b1_ref: (1, 256) f32
    # w2_ref: (1, 256) f32   (row form of Linear(256, 1).weight)
    # b2_ref: (1, 1)   f32 in SMEM
    # out_ref: (TB, 1) f32
    x = x_ref[...].astype(jnp.float32)
    # AdaptiveAvgPool2d(output_size=1) + Flatten -> (TB, C); spatial axis is the
    # sublane axis, so this is a VPU/sublane accumulation (no cross-lane XLU).
    feats = jnp.mean(x, axis=1)
    # Linear(320, 256) + ReLU  (MXU)
    h = jnp.dot(feats, w1_ref[...], preferred_element_type=jnp.float32) + b1_ref[...]
    h = jnp.maximum(h, 0.0)
    # Linear(256, 1) as VPU multiply + lane reduce (avoids N=1 MXU matmul)
    y = jnp.sum(h * w2_ref[...], axis=-1, keepdims=True) + b2_ref[0, 0]
    out_ref[...] = y


def init_head_params(key):
    """Deterministic PyTorch-style (uniform +/- 1/sqrt(fan_in)) init."""
    k1, k2, k3, k4 = jax.random.split(key, 4)
    lim1 = 1.0 / (FEAT_C ** 0.5)
    w1 = jax.random.uniform(k1, (FEAT_C, HIDDEN), jnp.float32, -lim1, lim1)
    b1 = jax.random.uniform(k2, (1, HIDDEN), jnp.float32, -lim1, lim1)
    lim2 = 1.0 / (HIDDEN ** 0.5)
    w2 = jax.random.uniform(k3, (1, HIDDEN), jnp.float32, -lim2, lim2)  # row form
    b2 = jax.random.uniform(k4, (1, 1), jnp.float32, -lim2, lim2)
    return w1, b1, w2, b2


def fine_tuned_backbone_forward(x_nchw, w1, b1, w2, b2, *, batch_tile=128):
    """Forward pass matching FineTunedBackbone.forward on the 320-ch feature map.

    x_nchw: (B, 320, H, W) in the PyTorch NCHW convention, any float dtype.
    """
    B, C, H, W = x_nchw.shape
    assert C == FEAT_C, f"expected {FEAT_C} feature channels, got {C}"
    HW = H * W

    # Channels-last for the kernel: (B, HW, C) puts the 320 channels on lanes.
    # TODO(synk): if the trunk emitted NHWC natively this transpose would vanish.
    x = jnp.transpose(x_nchw.reshape(B, C, HW), (0, 2, 1))

    # Batch tile: multiple of 8 (f32 sublane).  TB=128 keeps the double-buffered
    # input block well under the 32 MiB default scoped VMEM on all generations;
    # on v6e, larger tiles (256-512) + vmem_limit_bytes can be used.
    TB = min(batch_tile, _round_up(B, 8))
    B_pad = _round_up(B, TB)
    if B_pad != B:
        x = jnp.pad(x, ((0, B_pad - B), (0, 0), (0, 0)))

    grid = (B_pad // TB,)
    out = pl.pallas_call(
        head_kernel,
        out_shape=jax.ShapeDtypeStruct((B_pad, 1), jnp.float32),
        grid_spec=pltpu.PrefetchScalarGridSpec(
            num_scalar_prefetch=0,
            grid=grid,
            in_specs=[
                pl.BlockSpec((TB, HW, C), lambda i: (i, 0, 0)),        # activations
                pl.BlockSpec((C, HIDDEN), lambda i: (0, 0)),           # w1 (resident)
                pl.BlockSpec((1, HIDDEN), lambda i: (0, 0)),           # b1 (resident)
                pl.BlockSpec((1, HIDDEN), lambda i: (0, 0)),           # w2 row (resident)
                pl.BlockSpec(memory_space=pltpu.MemorySpace.SMEM),     # b2 scalar
            ],
            out_specs=pl.BlockSpec((TB, 1), lambda i: (i, 0)),
        ),
        compiler_params=pltpu.CompilerParams(
            dimension_semantics=("parallel",),
        ),
    )(x, w1, b1, w2, b2)

    out = out[:B]
    # torch .squeeze(): drop all size-1 dims -> (B,) for B > 1, () for B == 1.
    return jnp.squeeze(out)


fine_tuned_backbone_forward_jit = jax.jit(
    fine_tuned_backbone_forward, static_argnames=("batch_tile",)
)


def _reference_forward(x_nchw, w1, b1, w2, b2):
    feats = jnp.mean(x_nchw.astype(jnp.float32), axis=(2, 3))   # pool + flatten
    h = jnp.maximum(feats @ w1 + b1, 0.0)
    y = h @ w2.T + b2
    return jnp.squeeze(y)


if __name__ == "__main__":
    key = jax.random.PRNGKey(0)
    k_x, k_p = jax.random.split(key)

    # Small synthetic feature map the EfficientNet trunk would produce.
    B, H, W = 2, 8, 8
    x = jax.random.normal(k_x, (B, FEAT_C, H, W), jnp.float32)
    w1, b1, w2, b2 = init_head_params(k_p)

    out = fine_tuned_backbone_forward_jit(x, w1, b1, w2, b2)
    out = jax.block_until_ready(out)

    ref = _reference_forward(x, w1, b1, w2, b2)
    assert out.shape == (B,), out.shape
    assert jnp.allclose(out, ref, atol=1e-4, rtol=1e-4), (out, ref)

    print("KERNEL_OK")
</pallas_src>

<mosaic_0001>
module attributes {stable_mosaic.version = 11 : i64} {
  func.func @head_kernel(%arg0: i32, %arg1: memref<8x64x320xf32, #tpu.memory_space<vmem>>, %arg2: memref<320x256xf32, #tpu.memory_space<vmem>>, %arg3: memref<1x256xf32, #tpu.memory_space<vmem>>, %arg4: memref<1x256xf32, #tpu.memory_space<vmem>>, %arg5: memref<1x1xf32, #tpu.memory_space<smem>>, %arg6: memref<8x1xf32, #tpu.memory_space<vmem>>) attributes {dimension_semantics = [#tpu.dimension_semantics<parallel>], iteration_bounds = array<i64: 1>, scalar_prefetch = 0 : i64, scratch_operands = 0 : i64, tpu.core_type = #tpu.core_type<tc>, window_params = [{transform_indices = @transform_0, window_bounds = array<i64: 8, 64, 320>}, {pipeline_mode = #tpu.pipeline_mode<synchronous>, transform_indices = @transform_1, window_bounds = array<i64: 320, 256>}, {pipeline_mode = #tpu.pipeline_mode<synchronous>, transform_indices = @transform_2, window_bounds = array<i64: 1, 256>}, {pipeline_mode = #tpu.pipeline_mode<synchronous>, transform_indices = @transform_3, window_bounds = array<i64: 1, 256>}, {transform_indices = @transform_4, window_bounds = array<i64: 1, 1>}, {transform_indices = @transform_5, window_bounds = array<i64: 8, 1>}]} {
    %c0 = arith.constant 0 : index
    %c0_0 = arith.constant 0 : index
    %c0_1 = arith.constant 0 : index
    %0 = vector.load %arg1[%c0, %c0_0, %c0_1] : memref<8x64x320xf32, #tpu.memory_space<vmem>>, vector<8x64x320xf32>
    %cst = arith.constant dense<0.000000e+00> : vector<8x320xf32>
    %1 = vector.multi_reduction <add>, %0, %cst [1] : vector<8x64x320xf32> to vector<8x320xf32>
    %cst_2 = arith.constant 6.400000e+01 : f32
    %2 = vector.broadcast %cst_2 : f32 to vector<8x320xf32>
    %3 = arith.divf %1, %2 : vector<8x320xf32>
    %c0_3 = arith.constant 0 : index
    %c0_4 = arith.constant 0 : index
    %4 = vector.load %arg2[%c0_3, %c0_4] : memref<320x256xf32, #tpu.memory_space<vmem>>, vector<320x256xf32>
    %cst_5 = arith.constant dense<0.000000e+00> : vector<8x256xf32>
    %5 = tpu.matmul %3, %4, %cst_5 {dimension_numbers = #tpu.dot_dimension_numbers<[1], [0], [0], [1], [0, 0, 1, 1], [], []>} : vector<8x320xf32>, vector<320x256xf32>, vector<8x256xf32> -> vector<8x256xf32>
    %c0_6 = arith.constant 0 : index
    %c0_7 = arith.constant 0 : index
    %6 = vector.load %arg3[%c0_6, %c0_7] : memref<1x256xf32, #tpu.memory_space<vmem>>, vector<1x256xf32>
    %7 = vector.broadcast %6 : vector<1x256xf32> to vector<8x256xf32>
    %8 = arith.addf %5, %7 : vector<8x256xf32>
    %cst_8 = arith.constant 0.000000e+00 : f32
    %9 = vector.broadcast %cst_8 : f32 to vector<8x256xf32>
    %10 = arith.maximumf %8, %9 : vector<8x256xf32>
    %c0_9 = arith.constant 0 : index
    %c0_10 = arith.constant 0 : index
    %11 = vector.load %arg4[%c0_9, %c0_10] : memref<1x256xf32, #tpu.memory_space<vmem>>, vector<1x256xf32>
    %12 = vector.broadcast %11 : vector<1x256xf32> to vector<8x256xf32>
    %13 = arith.mulf %10, %12 : vector<8x256xf32>
    %cst_11 = arith.constant dense<0.000000e+00> : vector<8xf32>
    %14 = vector.multi_reduction <add>, %13, %cst_11 [1] : vector<8x256xf32> to vector<8xf32>
    %15 = vector.shape_cast %14 : vector<8xf32> to vector<8x1xf32>
    %c0_12 = arith.constant 0 : index
    %c0_13 = arith.constant 0 : index
    %16 = memref.load %arg5[%c0_12, %c0_13] : memref<1x1xf32, #tpu.memory_space<smem>>
    %17 = vector.broadcast %16 : f32 to vector<8x1xf32>
    %18 = arith.addf %15, %17 : vector<8x1xf32>
    %c0_14 = arith.constant 0 : index
    %c0_15 = arith.constant 0 : index
    %19 = vector.load %arg6[%c0_14, %c0_15] : memref<8x1xf32, #tpu.memory_space<vmem>>, vector<8x1xf32>
    tpu.vector_store %arg6[%c0_14, %c0_15], %18 {strides = array<i32>} : memref<8x1xf32, #tpu.memory_space<vmem>>, vector<8x1xf32>,
    return
  }
  func.func @transform_0(%arg0: i32) -> (i32, i32, i32) {
    %c0_i32 = arith.constant 0 : i32
    %c0_i32_0 = arith.constant 0 : i32
    %c0_i32_1 = arith.constant 0 : i32
    return %arg0, %c0_i32, %c0_i32_0 : i32, i32, i32
  }
  func.func @transform_1(%arg0: i32) -> (i32, i32) {
    %c0_i32 = arith.constant 0 : i32
    %c0_i32_0 = arith.constant 0 : i32
    %c0_i32_1 = arith.constant 0 : i32
    return %c0_i32, %c0_i32_0 : i32, i32
  }
  func.func @transform_2(%arg0: i32) -> (i32, i32) {
    %c0_i32 = arith.constant 0 : i32
    %c0_i32_0 = arith.constant 0 : i32
    %c0_i32_1 = arith.constant 0 : i32
    return %c0_i32, %c0_i32_0 : i32, i32
  }
  func.func @transform_3(%arg0: i32) -> (i32, i32) {
    %c0_i32 = arith.constant 0 : i32
    %c0_i32_0 = arith.constant 0 : i32
    %c0_i32_1 = arith.constant 0 : i32
    return %c0_i32, %c0_i32_0 : i32, i32
  }
  func.func @transform_4(%arg0: i32) -> (i32, i32) {
    %c0_i32 = arith.constant 0 : i32
    %c0_i32_0 = arith.constant 0 : i32
    %c0_i32_1 = arith.constant 0 : i32
    return %c0_i32, %c0_i32_0 : i32, i32
  }
  func.func @transform_5(%arg0: i32) -> (i32, i32) {
    %c0_i32 = arith.constant 0 : i32
    %c0_i32_0 = arith.constant 0 : i32
    return %arg0, %c0_i32 : i32, i32
  }
}

</mosaic_0001>

<bundles_post_ra>
// kernel: fine_tuned_backbone_forward.1
= control target key start
LH: loop header
LB: loop body
LE: loop exit
PB: predicated region body
PF: predicated region fallthrough
CT: control target
= control target key end

     0   :  { %v1019_v12 = vmov 0.0   ;;  %vm731_vm0 = vcmask 1041409   ;;  %vm733_vm1 = vcmask 1042434   ;;  %vm735_vm2 = vcmask 1043459   ;;  %s2081_s1 = inlined_call_operand.vmem [shape: f32[320,256], index: 1, kind: input, shape index: {}]   ;;  %s2082_s0 = inlined_call_operand.vmem [shape: f32[8,64,320], index: 0, kind: input, shape index: {}]   ;;  %s2083_s2 = inlined_call_operand.vmem [shape: f32[1,256], index: 2, kind: input, shape index: {}]   ;;  %s2084_s3 = inlined_call_operand.vmem [shape: f32[1,256], index: 3, kind: input, shape index: {}]   ;;  %s2085_s4 = inlined_call_operand.<no memory space> [shape: f32[1,1], index: 4, kind: input, shape index: {}]   ;;  %s2086_s5 = inlined_call_operand.vmem [shape: f32[8,1], index: 5, kind: output, shape index: {}]  }
   0x1   :  { %v616_v0 = vld [vmem:[%s2081_s1 + $0x8] sm:$0xff]  ;;  %v618_v1 = vld [vmem:[%s2081_s1 + $0x18] sm:$0xff]  ;;  %v615_v2 = vld [vmem:[%s2081_s1] sm:$0xff]  ;;  %898 = vmatprep.mubr.f32.mxu0 %v1019_v12  ;;  %vm737_vm3 = vcmask 1044484   ;;  %vm739_vm4 = vcmask 1045509   ;;  %vm741_vm5 = vcmask 1046534  }
   0x2   :  { %v934_v3 = vpack.c.bf16 %v618_v1, %v616_v0  ;;  %v617_v4 = vld [vmem:[%s2081_s1 + $0x10] sm:$0xff]  ;;  %v620_v5 = vld [vmem:[%s2081_s1 + $0x28] sm:$0xff]  ;;  %v622_v6 = vld [vmem:[%s2081_s1 + $0x38] sm:$0xff]  ;;  %vm743_vm6 = vcmask 1047559   ;;  %vm239_vm7 = vcmask 523264   ;;  %vm927_vm8 = vcmask 7168  }
   0x3   :  { %v936_v7 = vpack.c.bf16 %v617_v4, %v615_v2  ;;  %v938_v8 = vpack.c.bf16 %v622_v6, %v620_v5  ;;  %v619_v9 = vld [vmem:[%s2081_s1 + $0x20] sm:$0xff]  ;;  %v621_v10 = vld [vmem:[%s2081_s1 + $0x30] sm:$0xff]  ;;  %v624_v11 = vld [vmem:[%s2081_s1 + $0x48] sm:$0xff] }
   0x4   :  { %935 = vmatprep.subr.bf16.mxu1 %v934_v3  ;;  %v626_v13 = vld [vmem:[%s2081_s1 + $0x58] sm:$0xff]  ;;  %v940_v14 = vpack.c.bf16 %v621_v10, %v619_v9  ;;  %v623_v16 = vld [vmem:[%s2081_s1 + $0x40] sm:$0xff]  ;;  %v625_v17 = vld [vmem:[%s2081_s1 + $0x50] sm:$0xff] }
   0x5   :  { %937 = vmatpush1.bf16.msra.mxu1 %v936_v7  ;;  %v942_v15 = vpack.c.bf16 %v626_v13, %v624_v11  ;;  %v628_v18 = vld [vmem:[%s2081_s1 + $0x68] sm:$0xff]  ;;  %v630_v19 = vld [vmem:[%s2081_s1 + $0x78] sm:$0xff]  ;;  %v944_v20 = vpack.c.bf16 %v625_v17, %v623_v16  ;;  %v627_v22 = vld [vmem:[%s2081_s1 + $0x60] sm:$0xff] }
   0x6   :  { %939 = vmatprep.subr.bf16.mxu1 %v938_v8  ;;  %v946_v21 = vpack.c.bf16 %v630_v19, %v628_v18  ;;  %v629_v23 = vld [vmem:[%s2081_s1 + $0x70] sm:$0xff]  ;;  %v632_v24 = vld [vmem:[%s2081_s1 + $0x88] sm:$0xff]  ;;  %v634_v25 = vld [vmem:[%s2081_s1 + $0x98] sm:$0xff] }
   0x7   :  { %v948_v26 = vpack.c.bf16 %v629_v23, %v627_v22  ;;  %v950_v27 = vpack.c.bf16 %v634_v25, %v632_v24  ;;  %v631_v28 = vld [vmem:[%s2081_s1 + $0x80] sm:$0xff]  ;;  %v633_v29 = vld [vmem:[%s2081_s1 + $0x90] sm:$0xff]  ;;  %v636_v30 = vld [vmem:[%s2081_s1 + $0xa8] sm:$0xff] }
   0x8   :  { %v638_v31 = vld [vmem:[%s2081_s1 + $0xb8] sm:$0xff]  ;;  %v952_v32 = vpack.c.bf16 %v633_v29, %v631_v28  ;;  %v635_v33 = vld [vmem:[%s2081_s1 + $0xa0] sm:$0xff]  ;;  %v637_v34 = vld [vmem:[%s2081_s1 + $0xb0] sm:$0xff] }
   0x9   :  { %941 = vmatpush1.bf16.msra.mxu1 %v940_v14  ;;  %v954_v35 = vpack.c.bf16 %v638_v31, %v636_v30  ;;  %v640_v36 = vld [vmem:[%s2081_s1 + $0xc8] sm:$0xff]  ;;  %v682_v38 = vld [vmem:[%s2081_s1 + $0x218] sm:$0xff]  ;;  %v679_v41 = vld [vmem:[%s2081_s1 + $0x200] sm:$0xff]  ;;  %v956_v44 = vpack.c.bf16 %v637_v34, %v635_v33 }
   0xa   :  { %943 = vmatprep.subr.bf16.mxu1 %v942_v15  ;;  %v680_v37 = vld [vmem:[%s2081_s1 + $0x208] sm:$0xff]  ;;  %v642_v39 = vld [vmem:[%s2081_s1 + $0xd8] sm:$0xff]  ;;  %v681_v42 = vld [vmem:[%s2081_s1 + $0x210] sm:$0xff] }
   0xb   :  { %v998_v40 = vpack.c.bf16 %v682_v38, %v680_v37  ;;  %v1000_v43 = vpack.c.bf16 %v681_v42, %v679_v41  ;;  %v684_v45 = vld [vmem:[%s2081_s1 + $0x228] sm:$0xff]  ;;  %v686_v46 = vld [vmem:[%s2081_s1 + $0x238] sm:$0xff]  ;;  %v683_v47 = vld [vmem:[%s2081_s1 + $0x220] sm:$0xff]  ;;  %v958_v48 = vpack.c.bf16 %v642_v39, %v640_v36 }
   0xc   :  { %v639_v49 = vld [vmem:[%s2081_s1 + $0xc0] sm:$0xff]  ;;  %v641_v50 = vld [vmem:[%s2081_s1 + $0xd0] sm:$0xff]  ;;  %v1002_v51 = vpack.c.bf16 %v686_v46, %v684_v45  ;;  %v644_v53 = vld [vmem:[%s2081_s1 + $0xe8] sm:$0xff] }
   0xd   :  { %945 = vmatpush1.bf16.msra.mxu1 %v944_v20  ;;  %999 = vmatprep.subr.bf16.mxu0 %v998_v40  ;;  %v685_v52 = vld [vmem:[%s2081_s1 + $0x230] sm:$0xff]  ;;  %v646_v54 = vld [vmem:[%s2081_s1 + $0xf8] sm:$0xff]  ;;  %v688_v56 = vld [vmem:[%s2081_s1 + $0x248] sm:$0xff]  ;;  %v960_v60 = vpack.c.bf16 %v641_v50, %v639_v49 }
   0xe   :  { %947 = vmatprep.subr.bf16.mxu1 %v946_v21  ;;  %1001 = vmatpush1.bf16.msra.mxu0 %v1000_v43  ;;  %v1004_v55 = vpack.c.bf16 %v685_v52, %v683_v47  ;;  %v690_v57 = vld [vmem:[%s2081_s1 + $0x258] sm:$0xff]  ;;  %v687_v58 = vld [vmem:[%s2081_s1 + $0x240] sm:$0xff]  ;;  %v689_v59 = vld [vmem:[%s2081_s1 + $0x250] sm:$0xff]  ;;  %v962_v1 = vpack.c.bf16 %v646_v54, %v644_v53 }
   0xf   :  { %1003 = vmatprep.subr.bf16.mxu0 %v1002_v51  ;;  %v643_v61 = vld [vmem:[%s2081_s1 + $0xe0] sm:$0xff]  ;;  %v645_v62 = vld [vmem:[%s2081_s1 + $0xf0] sm:$0xff]  ;;  %v648_v63 = vld [vmem:[%s2081_s1 + $0x108] sm:$0xff]  ;;  %v1006_v0 = vpack.c.bf16 %v690_v57, %v688_v56  ;;  %v1008_v3 = vpack.c.bf16 %v689_v59, %v687_v58 }
  0x10   :  { %v650_v2 = vld [vmem:[%s2081_s1 + $0x118] sm:$0xff]  ;;  %v692_v4 = vld [vmem:[%s2081_s1 + $0x268] sm:$0xff]  ;;  %v691_v7 = vld [vmem:[%s2081_s1 + $0x260] sm:$0xff]  ;;  %v964_v13 = vpack.c.bf16 %v645_v62, %v643_v61 }
  0x11   :  { %949 = vmatpush1.bf16.msra.mxu1 %v948_v26  ;;  %v694_v5 = vld [vmem:[%s2081_s1 + $0x278] sm:$0xff]  ;;  %v693_v8 = vld [vmem:[%s2081_s1 + $0x270] sm:$0xff]  ;;  %v22_v9 = vld [vmem:[%s2082_s0 + $0x8] sm:$0xff]  ;;  %v966_v18 = vpack.c.bf16 %v650_v2, %v648_v63 }
  0x12   :  { %951 = vmatprep.subr.bf16.mxu1 %v950_v27  ;;  %1005 = vmatpush1.bf16.msra.mxu0 %v1004_v55  ;;  %v1010_v6 = vpack.c.bf16 %v694_v5, %v692_v4  ;;  %v647_v10 = vld [vmem:[%s2081_s1 + $0x100] sm:$0xff]  ;;  %v28_v12 = vld [vmem:[%s2082_s0 + $0x38] sm:$0xff]  ;;  %v649_v14 = vld [vmem:[%s2081_s1 + $0x110] sm:$0xff]  ;;  %v1012_v19 = vpack.c.bf16 %v693_v8, %v691_v7 }
  0x13   :  { %1007 = vmatprep.subr.bf16.mxu0 %v1006_v0  ;;  %v25_v11 = vld [vmem:[%s2082_s0 + $0x20] sm:$0xff]  ;;  %v1218_v15 = vld [vmem:[%s2081_s1 + $0x128] sm:$0xff]  ;;  %v1223_v16 = vld [vmem:[%s2081_s1 + $0x138] sm:$0xff] }
  0x14   :  { %v226_v17 = vadd.f32 %v25_v11, %v22_v9  ;;  %v31_v20 = vld [vmem:[%s2082_s0 + $0x50] sm:$0xff]  ;;  %v46_v21 = vld [vmem:[%s2082_s0 + $0xc8] sm:$0xff]  ;;  %v49_v22 = vld [vmem:[%s2082_s0 + $0xe0] sm:$0xff]  ;;  %v970_v43 = vpack.c.bf16 %v1223_v16, %v1218_v15 }
  0x15   :  { %953 = vmatpush1.bf16.msra.mxu1 %v952_v32  ;;  %v1237_v23 = vld [vmem:[%s2081_s1 + $0x120] sm:$0xff]  ;;  %v1242_v24 = vld [vmem:[%s2081_s1 + $0x130] sm:$0xff]  ;;  %v52_v25 = vld [vmem:[%s2082_s0 + $0xf8] sm:$0xff]  ;;  %v274_v27 = vadd.f32 %v49_v22, %v46_v21  ;;  %v968_v32 = vpack.c.bf16 %v649_v14, %v647_v10 }
  0x16   :  { %955 = vmatprep.subr.bf16.mxu1 %v954_v35  ;;  %1009 = vmatpush1.bf16.msra.mxu0 %v1008_v3  ;;  %v227_v26 = vadd.f32 %v226_v17, %v28_v12  ;;  %v1250_v28 = vld [vmem:[%s2081_s1 + $0x148] sm:$0xff]  ;;  %v1255_v29 = vld [vmem:[%s2081_s1 + $0x158] sm:$0xff]  ;;  %v55_v31 = vld [vmem:[%s2082_s0 + $0x110] sm:$0xff]  ;;  %v972_v59 = vpack.c.bf16 %v1242_v24, %v1237_v23 }
  0x17   :  { %1011 = vmatprep.subr.bf16.mxu0 %v1010_v6  ;;  %v34_v30 = vld [vmem:[%s2082_s0 + $0x68] sm:$0xff]  ;;  %v1266_v33 = vld [vmem:[%s2081_s1 + $0x140] sm:$0xff]  ;;  %v1271_v34 = vld [vmem:[%s2081_s1 + $0x150] sm:$0xff]  ;;  %v275_v42 = vadd.f32 %v274_v27, %v52_v25  ;;  %v974_v0 = vpack.c.bf16 %v1255_v29, %v1250_v28 }
  0x18   :  { %v1276_v35 = vld [vmem:[%s2081_s1 + $0x168] sm:$0xff]  ;;  %v1281_v36 = vld [vmem:[%s2081_s1 + $0x178] sm:$0xff]  ;;  %v1286_v37 = vld [vmem:[%s2081_s1 + $0x160] sm:$0xff]  ;;  %v228_v41 = vadd.f32 %v227_v26, %v31_v20  ;;  %v976_v11 = vpack.c.bf16 %v1271_v34, %v1266_v33 }
  0x19   :  { %957 = vmatpush1.bf16.msra.mxu1 %v956_v44  ;;  %v70_v38 = vld [vmem:[%s2082_s0 + $0x188] sm:$0xff]  ;;  %v73_v39 = vld [vmem:[%s2082_s0 + $0x1a0] sm:$0xff]  ;;  %v76_v40 = vld [vmem:[%s2082_s0 + $0x1b8] sm:$0xff]  ;;  %v276_v58 = vadd.f32 %v275_v42, %v55_v31  ;;  %v978_v12 = vpack.c.bf16 %v1281_v36, %v1276_v35 }
  0x1a   :  { %959 = vmatprep.subr.bf16.mxu1 %v958_v48  ;;  %v1302_v44 = vld [vmem:[%s2081_s1 + $0x170] sm:$0xff]  ;;  %1013 = vmatpush1.bf16.msra.mxu0 %v1012_v19  ;;  %v37_v45 = vld [vmem:[%s2082_s0 + $0x80] sm:$0xff]  ;;  %v58_v46 = vld [vmem:[%s2082_s0 + $0x128] sm:$0xff]  ;;  %v321_v47 = vadd.f32 %v73_v39, %v70_v38  ;;  %v229_v57 = vadd.f32 %v228_v41, %v34_v30 }
  0x1b   :  { %v1313_v48 = vld [vmem:[%s2081_s1 + $0x188] sm:$0xff]  ;;  %v1318_v49 = vld [vmem:[%s2081_s1 + $0x198] sm:$0xff]  ;;  %v1323_v50 = vld [vmem:[%s2081_s1 + $0x180] sm:$0xff]  ;;  %v277_v9 = vadd.f32 %v276_v58, %v58_v46 }
  0x1c   :  { %v1328_v51 = vld [vmem:[%s2081_s1 + $0x190] sm:$0xff]  ;;  %v1333_v52 = vld [vmem:[%s2081_s1 + $0x1a8] sm:$0xff]  ;;  %v1338_v53 = vld [vmem:[%s2081_s1 + $0x1b8] sm:$0xff]  ;;  %v322_v63 = vadd.f32 %v321_v47, %v76_v40  ;;  %v230_v8 = vadd.f32 %v229_v57, %v37_v45  ;;  %v982_v29 = vpack.c.bf16 %v1318_v49, %v1313_v48 }
  0x1d   :  { %961 = vmatpush1.bf16.msra.mxu1 %v960_v60  ;;  %v40_v54 = vld [vmem:[%s2082_s0 + $0x98] sm:$0xff]  ;;  %v79_v55 = vld [vmem:[%s2082_s0 + $0x1d0] sm:$0xff]  ;;  %v94_v56 = vld [vmem:[%s2082_s0 + $0x248] sm:$0xff]  ;;  %v984_v30 = vpack.c.bf16 %v1328_v51, %v1323_v50  ;;  %v986_v31 = vpack.c.bf16 %v1338_v53, %v1333_v52 }
  0x1e   :  { %963 = vmatprep.subr.bf16.mxu1 %v962_v1  ;;  %v61_v60 = vld [vmem:[%s2082_s0 + $0x140] sm:$0xff]  ;;  %v100_v62 = vld [vmem:[%s2082_s0 + $0x278] sm:$0xff]  ;;  %v1370_v2 = vld [vmem:[%s2081_s1 + $0x1b0] sm:$0xff]  ;;  %v323_v17 = vadd.f32 %v322_v63, %v79_v55  ;;  %v231_v25 = vadd.f32 %v230_v8, %v40_v54 }
  0x1f   :  { %v97_v61 = vld [vmem:[%s2082_s0 + $0x260] sm:$0xff]  ;;  %v1375_v3 = vld [vmem:[%s2081_s1 + $0x1c8] sm:$0xff]  ;;  %v1380_v4 = vld [vmem:[%s2081_s1 + $0x1d8] sm:$0xff]  ;;  %v278_v26 = vadd.f32 %v277_v9, %v61_v60 }
  0x20   :  { %v1365_v1 = vld [vmem:[%s2081_s1 + $0x1a0] sm:$0xff]  ;;  %v43_v5 = vld [vmem:[%s2082_s0 + $0xb0] sm:$0xff]  ;;  %v64_v6 = vld [vmem:[%s2082_s0 + $0x158] sm:$0xff]  ;;  %v368_v10 = vadd.f32 %v97_v61, %v94_v56  ;;  %v990_v55 = vpack.c.bf16 %v1380_v4, %v1375_v3 }
  0x21   :  { %965 = vmatpush1.bf16.msra.mxu1 %v964_v13  ;;  %v82_v7 = vld [vmem:[%s2082_s0 + $0x1e8] sm:$0xff]  ;;  %v980_v13 = vpack.c.bf16 %v1302_v44, %v1286_v37  ;;  %v103_v14 = vld [vmem:[%s2082_s0 + $0x290] sm:$0xff]  ;;  %v121_v16 = vld [vmem:[%s2082_s0 + $0x320] sm:$0xff]  ;;  %v279_v45 = vadd.f32 %v278_v26, %v64_v6  ;;  %v988_v54 = vpack.c.bf16 %v1370_v2, %v1365_v1 }
  0x22   :  { %967 = vmatprep.subr.bf16.mxu1 %v966_v18  ;;  %v118_v15 = vld [vmem:[%s2082_s0 + $0x308] sm:$0xff]  ;;  %v1409_v18 = vld [vmem:[%s2081_s1 + $0x1c0] sm:$0xff]  ;;  %v1414_v19 = vld [vmem:[%s2081_s1 + $0x1d0] sm:$0xff]  ;;  %v369_v27 = vadd.f32 %v368_v10, %v100_v62  ;;  %v324_v38 = vadd.f32 %v323_v17, %v82_v7 }
  0x23   :  { %v1419_v20 = vld [vmem:[%s2081_s1 + $0x1e8] sm:$0xff]  ;;  %v1424_v21 = vld [vmem:[%s2081_s1 + $0x1f8] sm:$0xff]  ;;  %v67_v22 = vld [vmem:[%s2082_s0 + $0x170] sm:$0xff]  ;;  %v415_v28 = vadd.f32 %v121_v16, %v118_v15  ;;  %v992_v8 = vpack.c.bf16 %v1414_v19, %v1409_v18 }
  0x24   :  { %v85_v23 = vld [vmem:[%s2082_s0 + $0x200] sm:$0xff]  ;;  %v124_v24 = vld [vmem:[%s2082_s0 + $0x338] sm:$0xff]  ;;  %v106_v33 = vld [vmem:[%s2082_s0 + $0x2a8] sm:$0xff]  ;;  %v370_v46 = vadd.f32 %v369_v27, %v103_v14  ;;  %v994_v9 = vpack.c.bf16 %v1424_v21, %v1419_v20 }
  0x25   :  { %969 = vmatpush1.bf16.msra.mxu1 %v968_v32  ;;  %v88_v32 = vld [vmem:[%s2082_s0 + $0x218] sm:$0xff]  ;;  %v127_v34 = vld [vmem:[%s2082_s0 + $0x350] sm:$0xff]  ;;  %v1453_v39 = vld [vmem:[%s2081_s1 + $0x1e0] sm:$0xff]  ;;  %v416_v47 = vadd.f32 %v415_v28, %v124_v24 }
  0x26   :  { %971 = vmatprep.subr.bf16.mxu1 %v970_v43  ;;  %v142_v40 = vld [vmem:[%s2082_s0 + $0x3c8] sm:$0xff]  ;;  %v145_v41 = vld [vmem:[%s2082_s0 + $0x3e0] sm:$0xff]  ;;  %v148_v42 = vld [vmem:[%s2082_s0 + $0x3f8] sm:$0xff]  ;;  %v232_v43 = vadd.f32 %v231_v25, %v43_v5  ;;  %v280_v5 = vadd.f32 %v279_v45, %v67_v22  ;;  %v371_v6 = vadd.f32 %v370_v46, %v106_v33 }
  0x27   :  { %v1471_v56 = vld [vmem:[%s2081_s1 + $0x1f0] sm:$0xff]  ;;  %v109_v57 = vld [vmem:[%s2082_s0 + $0x2c0] sm:$0xff]  ;;  %v130_v58 = vld [vmem:[%s2082_s0 + $0x368] sm:$0xff]  ;;  %v462_v60 = vadd.f32 %v145_v41, %v142_v40  ;;  %v417_v7 = vadd.f32 %v416_v47, %v127_v34 }
  0x28   :  { %v91_v61 = vld [vmem:[%s2082_s0 + $0x230] sm:$0xff]  ;;  %v166_v63 = vld [vmem:[%s2082_s0 + $0x488] sm:$0xff]  ;;  %v112_v10 = vld [vmem:[%s2082_s0 + $0x2d8] sm:$0xff]  ;;  %v281_v26 = vrot.slane %v280_v5, 4  ;;  %v372_v27 = vadd.f32 %v371_v6, %v109_v57 }
  0x29   :  { %973 = vmatpush1.bf16.msra.mxu1 %v972_v59  ;;  %v325_v59 = vadd.f32 %v324_v38, %v85_v23  ;;  %v151_v62 = vld [vmem:[%s2082_s0 + $0x410] sm:$0xff]  ;;  %v133_v14 = vld [vmem:[%s2082_s0 + $0x380] sm:$0xff]  ;;  %v463_v17 = vadd.f32 %v462_v60, %v148_v42  ;;  %v154_v23 = vld [vmem:[%s2082_s0 + $0x428] sm:$0xff]  ;;  %v418_v28 = vadd.f32 %v417_v7, %v130_v58 }
  0x2a   :  { %975 = vmatprep.subr.bf16.mxu1 %v974_v0  ;;  %v233_v0 = vrot.slane %v232_v43, 4  ;;  %v169_v15 = vld [vmem:[%s2082_s0 + $0x4a0] sm:$0xff]  ;;  %v115_v22 = vld [vmem:[%s2082_s0 + $0x2f0] sm:$0xff]  ;;  %v172_v24 = vld [vmem:[%s2082_s0 + $0x4b8] sm:$0xff]  ;;  %v373_v45 = vadd.f32 %v372_v27, %v112_v10 }
  0x2b   :  { %v326_v16 = vadd.f32 %v325_v59, %v88_v32  ;;  %v136_v32 = vld [vmem:[%s2082_s0 + $0x398] sm:$0xff]  ;;  %v190_v33 = vld [vmem:[%s2082_s0 + $0x548] sm:$0xff]  ;;  %v193_v34 = vld [vmem:[%s2082_s0 + $0x560] sm:$0xff]  ;;  %v464_v40 = vadd.f32 %v463_v17, %v151_v62  ;;  %v509_v41 = vadd.f32 %v169_v15, %v166_v63  ;;  %v419_v46 = vadd.f32 %v418_v28, %v133_v14 }
  0x2c   :  { %v234_v25 = vadd.f32 %v233_v0, %v232_v43  ;;  %v157_v35 = vld [vmem:[%s2082_s0 + $0x440] sm:$0xff]  ;;  %v175_v36 = vld [vmem:[%s2082_s0 + $0x4d0] sm:$0xff]  ;;  %v282_v43 = vadd.f32 %v281_v26, %v280_v5  ;;  %v556_v60 = vadd.f32 %v193_v34, %v190_v33  ;;  %v178_v62 = vld [vmem:[%s2082_s0 + $0x4e8] sm:$0xff]  ;;  %v374_v6 = vadd.f32 %v373_v45, %v115_v22 }
  0x2d   :  { %977 = vmatpush1.bf16.msra.mxu1 %v976_v11  ;;  %v996_v11 = vpack.c.bf16 %v1471_v56, %v1453_v39  ;;  %v327_v38 = vadd.f32 %v326_v16, %v91_v61  ;;  %v139_v47 = vld [vmem:[%s2082_s0 + $0x3b0] sm:$0xff]  ;;  %v465_v58 = vadd.f32 %v464_v40, %v154_v23  ;;  %v510_v59 = vadd.f32 %v509_v41, %v172_v24  ;;  %v160_v61 = vld [vmem:[%s2082_s0 + $0x458] sm:$0xff]  ;;  %v181_v15 = vld [vmem:[%s2082_s0 + $0x500] sm:$0xff] }
  0x2e   :  { %979 = vmatprep.subr.bf16.mxu1 %v978_v12  ;;  %v196_v12 = vld [vmem:[%s2082_s0 + $0x578] sm:$0xff]  ;;  %v235_v42 = vrot.slane %v234_v25, 2  ;;  %v199_v63 = vld [vmem:[%s2082_s0 + $0x590] sm:$0xff]  ;;  %v283_v5 = vrot.slane %v282_v43, 2  ;;  %v420_v7 = vadd.f32 %v419_v46, %v136_v32  ;;  %v202_v16 = vld [vmem:[%s2082_s0 + $0x5a8] sm:$0xff]  ;;  %v375_v48 = vrot.slane %v374_v6, 4 }
  0x2f   :  { %v328_v57 = vrot.slane %v327_v38, 4  ;;  %v466_v44 = vadd.f32 %v465_v58, %v157_v35  ;;  %v557_v10 = vadd.f32 %v556_v60, %v196_v12  ;;  %v163_v14 = vld [vmem:[%s2082_s0 + $0x470] sm:$0xff]  ;;  %v184_v26 = vld [vmem:[%s2082_s0 + $0x518] sm:$0xff]  ;;  %v205_v27 = vld [vmem:[%s2082_s0 + $0x5c0] sm:$0xff] }
  0x30   :  { %v236_v0 = vadd.f32 %v235_v42, %v234_v25  ;;  %v284_v22 = vadd.f32 %v283_v5, %v282_v43  ;;  %v421_v49 = vadd.f32 %v420_v7, %v139_v47  ;;  %v376_v33 = vadd.f32 %v375_v48, %v374_v6  ;;  %v24_v41 = vld [vmem:[%s2082_s0 + $0x18] sm:$0xff]  ;;  %v187_v35 = vld [vmem:[%s2082_s0 + $0x530] sm:$0xff]  ;;  %v30_v1 = vld [vmem:[%s2082_s0 + $0x48] sm:$0xff] }
  0x31   :  { %981 = vmatpush1.bf16.msra.mxu1 %v980_v13  ;;  %v329_v37 = vadd.f32 %v328_v57, %v327_v38  ;;  %v511_v13 = vadd.f32 %v510_v59, %v175_v36  ;;  %v467_v23 = vadd.f32 %v466_v44, %v160_v61  ;;  %v558_v25 = vadd.f32 %v557_v10, %v199_v63  ;;  %v208_v52 = vld [vmem:[%s2082_s0 + $0x5d8] sm:$0xff]  ;;  %v27_v47 = vld [vmem:[%s2082_s0 + $0x30] sm:$0xff]  ;;  %v45_v2 = vld [vmem:[%s2082_s0 + $0xc0] sm:$0xff] }
  0x32   :  { %983 = vmatprep.subr.bf16.mxu1 %v982_v29  ;;  %v237_v17 = vrot.slane %v236_v0, 1  ;;  %v285_v32 = vrot.slane %v284_v22, 1  ;;  %v422_v34 = vrot.slane %v421_v49, 4  ;;  %v211_v57 = vld [vmem:[%s2082_s0 + $0x5f0] sm:$0xff]  ;;  %v33_v10 = vld [vmem:[%s2082_s0 + $0x60] sm:$0xff] }
  0x33   :  { %v330_v29 = vrot.slane %v329_v37, 2  ;;  %v512_v24 = vadd.f32 %v511_v13, %v178_v62  ;;  %v468_v40 = vadd.f32 %v467_v23, %v163_v14  ;;  %v559_v51 = vadd.f32 %v558_v25, %v202_v16  ;;  %v51_v14 = vld [vmem:[%s2082_s0 + $0xf0] sm:$0xff] }
  0x34   :  { %v238_v28 = vadd.f32 %v237_v17, %v236_v0  ;;  %v286_v53 = vadd.f32 %v285_v32, %v284_v22  ;;  %v423_v36 = vadd.f32 %v422_v34, %v421_v49  ;;  %v69_v17 = vld [vmem:[%s2082_s0 + $0x180] sm:$0xff]  ;;  %v72_v22 = vld [vmem:[%s2082_s0 + $0x198] sm:$0xff]  ;;  %v39_v20 = vld [vmem:[%s2082_s0 + $0x90] sm:$0xff] }
  0x35   :  { %985 = vmatpush1.bf16.msra.mxu1 %v984_v30  ;;  %v331_v38 = vadd.f32 %v330_v29, %v329_v37  ;;  %v513_v50 = vadd.f32 %v512_v24, %v181_v15  ;;  %v21_v30 = vld [vmem:[%s2082_s0] sm:$0xff]  ;;  %v469_v43 = vrot.slane %v468_v40, 4  ;;  %v560_v46 = vadd.f32 %v559_v51, %v205_v27  ;;  %v54_v24 = vld [vmem:[%s2082_s0 + $0x108] sm:$0xff]  ;;  %v75_v21 = vld [vmem:[%s2082_s0 + $0x1b0] sm:$0xff] }
  0x36   :  { %987 = vmatprep.subr.bf16.mxu1 %v986_v31  ;;  %v377_v31 = vrot.slane %v376_v33, 2  ;;  %v592_v12 = vmul.f32 0.015625, %v238_v28  ;;  %v424_v59 = vrot.slane %v423_v36, 2  ;;  %v595_v60 = vmul.f32 0.015625, %v286_v53  ;;  %v57_v34 = vld [vmem:[%s2082_s0 + $0x120] sm:$0xff] }
  0x37   :  { %v332_v42 = vrot.slane %v331_v38, 1  ;;  %v514_v45 = vadd.f32 %v513_v50, %v184_v26  ;;  %v213_v61 = vadd.f32 %v24_v41, %v21_v30  ;;  %v470_v63 = vadd.f32 %v469_v43, %v468_v40  ;;  %v96_v40 = vld [vmem:[%s2082_s0 + $0x258] sm:$0xff]  ;;  %v42_v41 = vld [vmem:[%s2082_s0 + $0xa8] sm:$0xff] }
  0x38   :  { %v378_v58 = vadd.f32 %v377_v31, %v376_v33  ;;  %v561_v5 = vadd.f32 %v560_v46, %v208_v52  ;;  %v425_v7 = vadd.f32 %v424_v59, %v423_v36  ;;  %v745_v3 = vsel %vm731_vm0, %v595_v60, %v592_v12  ;;  %v78_v52 = vld [vmem:[%s2082_s0 + $0x1c8] sm:$0xff]  ;;  %v99_v36 = vld [vmem:[%s2082_s0 + $0x270] sm:$0xff]  ;;  %v117_v12 = vld [vmem:[%s2082_s0 + $0x300] sm:$0xff] }
  0x39   :  { %989 = vmatpush1.bf16.msra.mxu1 %v988_v54  ;;  %v333_v62 = vadd.f32 %v332_v42, %v331_v38  ;;  %v515_v0 = vadd.f32 %v514_v45, %v187_v35  ;;  %v48_v54 = vld [vmem:[%s2082_s0 + $0xd8] sm:$0xff]  ;;  %v214_v4 = vadd.f32 %v213_v61, %v27_v47  ;;  %v93_v38 = vld [vmem:[%s2082_s0 + $0x240] sm:$0xff]  ;;  %v308_v50 = vadd.f32 %v72_v22, %v69_v17  ;;  %v147_v17 = vld [vmem:[%s2082_s0 + $0x3f0] sm:$0xff] }
  0x3a   :  { %991 = vmatprep.subr.bf16.mxu1 %v990_v55  ;;  %v379_v6 = vrot.slane %v378_v58, 1  ;;  %v471_v55 = vrot.slane %v470_v63, 2  ;;  %v562_v44 = vadd.f32 %v561_v5, %v211_v57  ;;  %v426_v16 = vrot.slane %v425_v7, 1  ;;  %v60_v35 = vld [vmem:[%s2082_s0 + $0x138] sm:$0xff]  ;;  %v81_v46 = vld [vmem:[%s2082_s0 + $0x1e0] sm:$0xff] }
  0x3b   :  { %v516_v37 = vrot.slane %v515_v0, 4  ;;  %v598_v13 = vmul.f32 0.015625, %v333_v62  ;;  %v215_v48 = vadd.f32 %v214_v4, %v30_v1  ;;  %v261_v49 = vadd.f32 %v48_v54, %v45_v2  ;;  %v120_v42 = vld [vmem:[%s2082_s0 + $0x318] sm:$0xff]  ;;  %v63_v62 = vld [vmem:[%s2082_s0 + $0x150] sm:$0xff]  ;;  %v141_v2 = vld [vmem:[%s2082_s0 + $0x3c0] sm:$0xff] }
  0x3c   :  { %v380_v15 = vadd.f32 %v379_v6, %v378_v58  ;;  %v472_v29 = vadd.f32 %v471_v55, %v470_v63  ;;  %v563_v18 = vrot.slane %v562_v44, 4  ;;  %v427_v25 = vadd.f32 %v426_v16, %v425_v7  ;;  %v102_v63 = vld [vmem:[%s2082_s0 + $0x288] sm:$0xff]  ;;  %v84_v1 = vld [vmem:[%s2082_s0 + $0x1f8] sm:$0xff]  ;;  %v87_v16 = vld [vmem:[%s2082_s0 + $0x210] sm:$0xff] }
  0x3d   :  { %993 = vmatpush1.bf16.msra.mxu1 %v992_v8  ;;  %v517_v23 = vadd.f32 %v516_v37, %v515_v0  ;;  %v746_v19 = vsel %vm733_vm1, %v598_v13, %v745_v3  ;;  %v36_v8 = vld [vmem:[%s2082_s0 + $0x78] sm:$0xff]  ;;  %v262_v27 = vadd.f32 %v261_v49, %v51_v14  ;;  %v309_v43 = vadd.f32 %v308_v50, %v75_v21  ;;  %v123_v0 = vld [vmem:[%s2082_s0 + $0x330] sm:$0xff]  ;;  %v66_v13 = vld [vmem:[%s2082_s0 + $0x168] sm:$0xff] }
  0x3e   :  { %995 = vmatprep.subr.bf16.mxu1 %v994_v9  ;;  %v601_v26 = vmul.f32 0.015625, %v380_v15  ;;  %v216_v9 = vadd.f32 %v215_v48, %v33_v10  ;;  %v473_v28 = vrot.slane %v472_v29, 1  ;;  %v564_v33 = vadd.f32 %v563_v18, %v562_v44  ;;  %v144_v54 = vld [vmem:[%s2082_s0 + $0x3d8] sm:$0xff]  ;;  %v105_v10 = vld [vmem:[%s2082_s0 + $0x2a0] sm:$0xff]  ;;  %v126_v14 = vld [vmem:[%s2082_s0 + $0x348] sm:$0xff] }
  0x3f   :  { %v518_v32 = vrot.slane %v517_v23, 2  ;;  %v604_v51 = vmul.f32 0.015625, %v427_v25  ;;  %v263_v31 = vadd.f32 %v262_v27, %v54_v24  ;;  %v355_v58 = vadd.f32 %v96_v40, %v93_v38  ;;  %v129_v24 = vld [vmem:[%s2082_s0 + $0x360] sm:$0xff]  ;;  %v111_v40 = vld [vmem:[%s2082_s0 + $0x2d0] sm:$0xff]  ;;  %v132_v50 = vld [vmem:[%s2082_s0 + $0x378] sm:$0xff] }
  0x40   :  { %v747_v30 = vsel %vm735_vm2, %v601_v26, %v746_v19  ;;  %v217_v53 = vadd.f32 %v216_v9, %v36_v8  ;;  %v474_v39 = vadd.f32 %v473_v28, %v472_v29  ;;  %v310_v5 = vadd.f32 %v309_v43, %v78_v52  ;;  %v90_v19 = vld [vmem:[%s2082_s0 + $0x228] sm:$0xff]  ;;  %v108_v8 = vld [vmem:[%s2082_s0 + $0x2b8] sm:$0xff]  ;;  %v165_v21 = vld [vmem:[%s2082_s0 + $0x480] sm:$0xff] }
  0x41   :  { %997 = vmatpush1.bf16.msra.mxu1 %v996_v11  ;;  %v519_v56 = vadd.f32 %v518_v32, %v517_v23  ;;  %v565_v11 = vrot.slane %v564_v33, 2  ;;  %v748_v45 = vsel %vm737_vm3, %v604_v51, %v747_v30  ;;  %v264_v57 = vadd.f32 %v263_v31, %v57_v34  ;;  %v168_v9 = vld [vmem:[%s2082_s0 + $0x498] sm:$0xff]  ;;  %v153_v51 = vld [vmem:[%s2082_s0 + $0x420] sm:$0xff] }
  0x42   :  { %v218_v47 = vadd.f32 %v217_v53, %v39_v20  ;;  %v607_v61 = vmul.f32 0.015625, %v474_v39  ;;  %v356_v3 = vadd.f32 %v355_v58, %v99_v36  ;;  %v402_v4 = vadd.f32 %v120_v42, %v117_v12  ;;  %v150_v20 = vld [vmem:[%s2082_s0 + $0x408] sm:$0xff]  ;;  %v189_v52 = vld [vmem:[%s2082_s0 + $0x540] sm:$0xff]  ;;  %v192_v53 = vld [vmem:[%s2082_s0 + $0x558] sm:$0xff] }
  0x43   :  { %v520_v59 = vrot.slane %v519_v56, 1  ;;  %v566_v60 = vadd.f32 %v565_v11, %v564_v33  ;;  %v265_v7 = vadd.f32 %v264_v57, %v60_v35  ;;  %v311_v15 = vadd.f32 %v310_v5, %v81_v46  ;;  %v171_v35 = vld [vmem:[%s2082_s0 + $0x4b0] sm:$0xff]  ;;  %v114_v12 = vld [vmem:[%s2082_s0 + $0x2e8] sm:$0xff] }
  0x44   :  { %v219_v6 = vadd.f32 %v218_v47, %v42_v41  ;;  %v749_v44 = vsel %vm739_vm4, %v607_v61, %v748_v45  ;;  %v357_v49 = vadd.f32 %v356_v3, %v102_v63  ;;  %v403_v29 = vadd.f32 %v402_v4, %v123_v0  ;;  %v135_v42 = vld [vmem:[%s2082_s0 + $0x390] sm:$0xff]  ;;  %v156_v47 = vld [vmem:[%s2082_s0 + $0x438] sm:$0xff]  ;;  %v174_v57 = vld [vmem:[%s2082_s0 + $0x4c8] sm:$0xff] }
  0x45   :  { %v521_v55 = vadd.f32 %v520_v59, %v519_v56  ;;  %v567_v37 = vrot.slane %v566_v60, 1  ;;  %v266_v48 = vadd.f32 %v265_v7, %v63_v62  ;;  %v312_v25 = vadd.f32 %v311_v15, %v84_v1  ;;  %v195_v58 = vld [vmem:[%s2082_s0 + $0x570] sm:$0xff]  ;;  %v138_v63 = vld [vmem:[%s2082_s0 + $0x3a8] sm:$0xff] }
  0x46   :  { %v220_v22 = vrot.slane %v219_v6, 4  ;;  %v449_v26 = vadd.f32 %v144_v54, %v141_v2  ;;  %v358_v32 = vadd.f32 %v357_v49, %v105_v10  ;;  %v404_v33 = vadd.f32 %v403_v29, %v126_v14  ;;  %v159_v54 = vld [vmem:[%s2082_s0 + $0x450] sm:$0xff]  ;;  %v198_v7 = vld [vmem:[%s2082_s0 + $0x588] sm:$0xff] }
  0x47   :  { %v568_v23 = vadd.f32 %v567_v37, %v566_v60  ;;  %v610_v18 = vmul.f32 0.015625, %v521_v55  ;;  %v267_v28 = vadd.f32 %v266_v48, %v66_v13  ;;  %v313_v30 = vadd.f32 %v312_v25, %v87_v16  ;;  %v162_v15 = vld [vmem:[%s2082_s0 + $0x468] sm:$0xff]  ;;  %v180_v16 = vld [vmem:[%s2082_s0 + $0x4f8] sm:$0xff]  ;;  %v183_v25 = vld [vmem:[%s2082_s0 + $0x510] sm:$0xff] }
  0x48   :  { %v221_v27 = vadd.f32 %v220_v22, %v219_v6  ;;  %v450_v41 = vadd.f32 %v449_v26, %v147_v17  ;;  %v359_v56 = vadd.f32 %v358_v32, %v108_v8  ;;  %v405_v11 = vadd.f32 %v404_v33, %v129_v24  ;;  %v177_v6 = vld [vmem:[%s2082_s0 + $0x4e0] sm:$0xff]  ;;  %v23_v24 = vld [vmem:[%s2082_s0 + $0x10] sm:$0xff]  ;;  %v204_v26 = vld [vmem:[%s2082_s0 + $0x5b8] sm:$0xff] }
  0x49   :  { %v613_v34 = vmul.f32 0.015625, %v568_v23  ;;  %v750_v38 = vsel %vm741_vm5, %v610_v18, %v749_v44  ;;  %v268_v39 = vrot.slane %v267_v28, 4  ;;  %v314_v43 = vadd.f32 %v313_v30, %v90_v19  ;;  %v201_v17 = vld [vmem:[%s2082_s0 + $0x5a0] sm:$0xff] }
  0x4a   :  { %v222_v31 = vrot.slane %v221_v27, 2  ;;  %v451_v45 = vadd.f32 %v450_v41, %v150_v20  ;;  %v496_v46 = vadd.f32 %v168_v9, %v165_v21  ;;  %v360_v61 = vadd.f32 %v359_v56, %v111_v40  ;;  %v186_v40 = vld [vmem:[%s2082_s0 + $0x528] sm:$0xff] }
  0x4b   :  { %v751_v36 = vsel %vm743_vm6, %v613_v34, %v750_v38  ;;  %v269_v60 = vadd.f32 %v268_v39, %v267_v28  ;;  %v406_v62 = vadd.f32 %v405_v11, %v132_v50  ;;  %v315_v0 = vrot.slane %v314_v43, 4  ;;  %v26_v38 = vld [vmem:[%s2082_s0 + $0x28] sm:$0xff]  ;;  %v207_v50 = vld [vmem:[%s2082_s0 + $0x5d0] sm:$0xff] }
  0x4c   :  { %827 = vmatprep.mubr.f32.mxu1 %v751_v36  ;;  %v223_v59 = vadd.f32 %v222_v31, %v221_v27  ;;  %v452_v5 = vadd.f32 %v451_v45, %v153_v51  ;;  %v497_v1 = vadd.f32 %v496_v46, %v171_v35  ;;  %v543_v2 = vadd.f32 %v192_v53, %v189_v52  ;;  %v210_v56 = vld [vmem:[%s2082_s0 + $0x5e8] sm:$0xff] }
  0x4d   :  { %v270_v4 = vrot.slane %v269_v60, 2  ;;  %v361_v55 = vadd.f32 %v360_v61, %v114_v12  ;;  %v407_v37 = vadd.f32 %v406_v62, %v135_v42  ;;  %v316_v44 = vadd.f32 %v315_v0, %v314_v43 }
  0x4e   :  { %v224_v3 = vrot.slane %v223_v59, 1  ;;  %v453_v13 = vadd.f32 %v452_v5, %v156_v47  ;;  %v498_v10 = vadd.f32 %v497_v1, %v174_v57  ;;  %v544_v14 = vadd.f32 %v543_v2, %v195_v58  ;;  %v29_v57 = vld [vmem:[%s2082_s0 + $0x40] sm:$0xff]  ;;  %v32_v58 = vld [vmem:[%s2082_s0 + $0x58] sm:$0xff] }
  0x4f   :  { %v271_v48 = vadd.f32 %v270_v4, %v269_v60  ;;  %v362_v49 = vrot.slane %v361_v55, 4  ;;  %v408_v29 = vadd.f32 %v407_v37, %v138_v63  ;;  %v317_v23 = vrot.slane %v316_v44, 2 }
  0x50   :  { %v225_v22 = vadd.f32 %v224_v3, %v223_v59  ;;  %v454_v18 = vadd.f32 %v453_v13, %v159_v54  ;;  %v499_v19 = vadd.f32 %v498_v10, %v177_v6  ;;  %v545_v8 = vadd.f32 %v544_v14, %v198_v7  ;;  %v35_v6 = vld [vmem:[%s2082_s0 + $0x70] sm:$0xff]  ;;  %v38_v13 = vld [vmem:[%s2082_s0 + $0x88] sm:$0xff] }
  0x51   :  { %v272_v20 = vrot.slane %v271_v48, 1  ;;  %v363_v21 = vadd.f32 %v362_v49, %v361_v55  ;;  %v409_v9 = vrot.slane %v408_v29, 4  ;;  %v318_v28 = vadd.f32 %v317_v23, %v316_v44  ;;  %v47_v49 = vld [vmem:[%s2082_s0 + $0xd0] sm:$0xff] }
  0x52   :  { %v591_v27 = vmul.f32 0.015625, %v225_v22  ;;  %v455_v32 = vadd.f32 %v454_v18, %v162_v15  ;;  %v500_v33 = vadd.f32 %v499_v19, %v180_v16  ;;  %v546_v34 = vadd.f32 %v545_v8, %v201_v17  ;;  %v41_v15 = vld [vmem:[%s2082_s0 + $0xa0] sm:$0xff] }
  0x53   :  { %v273_v51 = vadd.f32 %v272_v20, %v271_v48  ;;  %v364_v30 = vrot.slane %v363_v21, 2  ;;  %v410_v41 = vadd.f32 %v409_v9, %v408_v29  ;;  %v240_v35 = vsel %vm239_vm7, %v23_v24, 0.0  ;;  %v50_v29 = vld [vmem:[%s2082_s0 + $0xe8] sm:$0xff]  ;;  %v56_v9 = vld [vmem:[%s2082_s0 + $0x118] sm:$0xff] }
  0x54   :  { %v319_v52 = vrot.slane %v318_v28, 1  ;;  %v456_v53 = vrot.slane %v455_v32, 4  ;;  %v501_v31 = vadd.f32 %v500_v33, %v183_v25  ;;  %v547_v39 = vadd.f32 %v546_v34, %v204_v26 }
  0x55   :  { %v365_v11 = vadd.f32 %v364_v30, %v363_v21  ;;  %v411_v36 = vrot.slane %v410_v41, 2  ;;  %v594_v12 = vmul.f32 0.015625, %v273_v51  ;;  %v241_v42 = vsel %vm239_vm7, %v26_v38, 0.0  ;;  %v53_v21 = vld [vmem:[%s2082_s0 + $0x100] sm:$0xff]  ;;  %v59_v30 = vld [vmem:[%s2082_s0 + $0x130] sm:$0xff] }
  0x56   :  { %v320_v43 = vadd.f32 %v319_v52, %v318_v28  ;;  %v457_v45 = vadd.f32 %v456_v53, %v455_v32  ;;  %v502_v46 = vadd.f32 %v501_v31, %v186_v40  ;;  %v548_v47 = vadd.f32 %v547_v39, %v207_v50  ;;  %v44_v32 = vld [vmem:[%s2082_s0 + $0xb8] sm:$0xff] }
  0x57   :  { %v366_v59 = vrot.slane %v365_v11, 1  ;;  %v412_v60 = vadd.f32 %v411_v36, %v410_v41  ;;  %v732_v61 = vsel %vm731_vm0, %v594_v12, %v591_v27  ;;  %v242_v62 = vadd.f32 %v241_v42, %v240_v35  ;;  %v71_v35 = vld [vmem:[%s2082_s0 + $0x190] sm:$0xff]  ;;  %v74_v36 = vld [vmem:[%s2082_s0 + $0x1a8] sm:$0xff]  ;;  %v77_v12 = vld [vmem:[%s2082_s0 + $0x1c0] sm:$0xff] }
  0x58   :  { %v458_v63 = vrot.slane %v457_v45, 2  ;;  %v503_v0 = vrot.slane %v502_v46, 4  ;;  %v549_v5 = vadd.f32 %v548_v47, %v210_v56  ;;  %v597_v1 = vmul.f32 0.015625, %v320_v43 }
  0x59   :  { %v367_v2 = vadd.f32 %v366_v59, %v365_v11  ;;  %v413_v54 = vrot.slane %v412_v60, 1  ;;  %v243_v7 = vsel %vm239_vm7, %v29_v57, 0.0  ;;  %v245_v3 = vsel %vm239_vm7, %v32_v58, 0.0  ;;  %v62_v11 = vld [vmem:[%s2082_s0 + $0x148] sm:$0xff]  ;;  %v65_v59 = vld [vmem:[%s2082_s0 + $0x160] sm:$0xff] }
  0x5a   :  { %v459_v4 = vadd.f32 %v458_v63, %v457_v45  ;;  %v504_v55 = vadd.f32 %v503_v0, %v502_v46  ;;  %v550_v37 = vrot.slane %v549_v5, 4  ;;  %v734_v44 = vsel %vm733_vm1, %v597_v1, %v732_v61  ;;  %v80_v61 = vld [vmem:[%s2082_s0 + $0x1d8] sm:$0xff]  ;;  %v83_v0 = vld [vmem:[%s2082_s0 + $0x1f0] sm:$0xff] }
  0x5b   :  { %v414_v10 = vadd.f32 %v413_v54, %v412_v60  ;;  %v600_v14 = vmul.f32 0.015625, %v367_v2  ;;  %v244_v16 = vadd.f32 %v243_v7, %v242_v62  ;;  %v247_v23 = vsel %vm239_vm7, %v35_v6, 0.0  ;;  %v68_v60 = vld [vmem:[%s2082_s0 + $0x178] sm:$0xff] }
  0x5c   :  { %v460_v17 = vrot.slane %v459_v4, 1  ;;  %v505_v22 = vrot.slane %v504_v55, 2  ;;  %v551_v48 = vadd.f32 %v550_v37, %v549_v5  ;;  %v249_v24 = vsel %vm239_vm7, %v38_v13, 0.0 }
  0x5d   :  { %v603_v18 = vmul.f32 0.015625, %v414_v10  ;;  %v736_v19 = vsel %vm735_vm2, %v600_v14, %v734_v44  ;;  %v246_v8 = vadd.f32 %v245_v3, %v244_v16  ;;  %v251_v27 = vsel %vm239_vm7, %v41_v15, 0.0  ;;  %v95_v3 = vld [vmem:[%s2082_s0 + $0x250] sm:$0xff] }
  0x5e   :  { %v461_v25 = vadd.f32 %v460_v17, %v459_v4  ;;  %v506_v26 = vadd.f32 %v505_v22, %v504_v55  ;;  %v552_v20 = vrot.slane %v551_v48, 2  ;;  %v287_v34 = vsel %vm239_vm7, %v47_v49, 0.0  ;;  %v98_v4 = vld [vmem:[%s2082_s0 + $0x268] sm:$0xff]  ;;  %v101_v55 = vld [vmem:[%s2082_s0 + $0x280] sm:$0xff] }
  0x5f   :  { %v738_v28 = vsel %vm737_vm3, %v603_v18, %v736_v19  ;;  %v248_v33 = vadd.f32 %v247_v23, %v246_v8  ;;  %v288_v38 = vsel %vm239_vm7, %v50_v29, 0.0  ;;  %v290_v53 = vsel %vm239_vm7, %v53_v21, 0.0  ;;  %v86_v17 = vld [vmem:[%s2082_s0 + $0x208] sm:$0xff]  ;;  %v89_v22 = vld [vmem:[%s2082_s0 + $0x220] sm:$0xff]  ;;  %v107_v18 = vld [vmem:[%s2082_s0 + $0x2b0] sm:$0xff] }
  0x60   :  { %v507_v40 = vrot.slane %v506_v26, 1  ;;  %v553_v50 = vadd.f32 %v552_v20, %v551_v48  ;;  %v606_v51 = vmul.f32 0.015625, %v461_v25  ;;  %v289_v41 = vadd.f32 %v288_v38, %v287_v34  ;;  %v104_v48 = vld [vmem:[%s2082_s0 + $0x298] sm:$0xff]  ;;  %v122_v20 = vld [vmem:[%s2082_s0 + $0x328] sm:$0xff]  ;;  %v125_v21 = vld [vmem:[%s2082_s0 + $0x340] sm:$0xff] }
  0x61   :  { %v250_v52 = vadd.f32 %v249_v24, %v248_v33  ;;  %v292_v31 = vsel %vm239_vm7, %v56_v9, 0.0  ;;  %v253_v42 = vsel %vm239_vm7, %v44_v32, 0.0  ;;  %v294_v47 = vsel %vm239_vm7, %v59_v30, 0.0 }
  0x62   :  { %v508_v39 = vadd.f32 %v507_v40, %v506_v26  ;;  %v554_v56 = vrot.slane %v553_v50, 1  ;;  %v291_v43 = vadd.f32 %v290_v53, %v289_v41  ;;  %v740_v45 = vsel %vm739_vm4, %v606_v51, %v738_v28  ;;  %v119_v26 = vld [vmem:[%s2082_s0 + $0x310] sm:$0xff]  ;;  %v92_v40 = vld [vmem:[%s2082_s0 + $0x238] sm:$0xff] }
  0x63   :  { %v252_v46 = vadd.f32 %v251_v27, %v250_v52  ;;  %v334_v63 = vsel %vm239_vm7, %v71_v35, 0.0  ;;  %v296_v1 = vsel %vm239_vm7, %v62_v11, 0.0  ;;  %v335_v2 = vsel %vm239_vm7, %v74_v36, 0.0  ;;  %v128_v51 = vld [vmem:[%s2082_s0 + $0x358] sm:$0xff]  ;;  %v113_v11 = vld [vmem:[%s2082_s0 + $0x2e0] sm:$0xff] }
  0x64   :  { %v555_v57 = vadd.f32 %v554_v56, %v553_v50  ;;  %v609_v58 = vmul.f32 0.015625, %v508_v39  ;;  %v293_v62 = vadd.f32 %v292_v31, %v291_v43  ;;  %v337_v54 = vsel %vm239_vm7, %v77_v12, 0.0  ;;  %v110_v50 = vld [vmem:[%s2082_s0 + $0x2c8] sm:$0xff]  ;;  %v116_v36 = vld [vmem:[%s2082_s0 + $0x2f8] sm:$0xff]  ;;  %v131_v12 = vld [vmem:[%s2082_s0 + $0x370] sm:$0xff] }
  0x65   :  { %v254_v5 = vadd.f32 %v253_v42, %v252_v46  ;;  %v336_v44 = vadd.f32 %v335_v2, %v334_v63  ;;  %v298_v10 = vsel %vm239_vm7, %v65_v59, 0.0  ;;  %v300_v14 = vsel %vm239_vm7, %v68_v60, 0.0  ;;  %v149_v2 = vld [vmem:[%s2082_s0 + $0x400] sm:$0xff] }
  0x66   :  { %v612_v6 = vmul.f32 0.015625, %v555_v57  ;;  %v742_v7 = vsel %vm741_vm5, %v609_v58, %v740_v45  ;;  %v295_v37 = vadd.f32 %v294_v47, %v293_v62  ;;  %v339_v15 = vsel %vm239_vm7, %v80_v61, 0.0  ;;  %v143_v47 = vld [vmem:[%s2082_s0 + $0x3d0] sm:$0xff]  ;;  %v134_v61 = vld [vmem:[%s2082_s0 + $0x388] sm:$0xff] }
  0x67   :  { %v255_v13 = vrot.slane %v254_v5, 4  ;;  %v338_v29 = vadd.f32 %v337_v54, %v336_v44  ;;  %v341_v23 = vsel %vm239_vm7, %v83_v0, 0.0  ;;  %v381_v8 = vsel %vm239_vm7, %v95_v3, 0.0  ;;  %v146_v62 = vld [vmem:[%s2082_s0 + $0x3e8] sm:$0xff]  ;;  %v137_v3 = vld [vmem:[%s2082_s0 + $0x3a0] sm:$0xff] }
  0x68   :  { %v744_v16 = vsel %vm743_vm6, %v612_v6, %v742_v7  ;;  %v297_v49 = vadd.f32 %v296_v1, %v295_v37  ;;  %v382_v24 = vsel %vm239_vm7, %v98_v4, 0.0  ;;  %v384_v25 = vsel %vm239_vm7, %v101_v55, 0.0  ;;  %v140_v4 = vld [vmem:[%s2082_s0 + $0x3b8] sm:$0xff] }
  0x69   :  { %828 = vmatmul.mubr.f32.vlgmr.msra.gmra.mrb[0].mxu1 %v744_v16  ;;  %v256_v19 = vadd.f32 %v255_v13, %v254_v5  ;;  %v340_v27 = vadd.f32 %v339_v15, %v338_v29  ;;  %v383_v28 = vadd.f32 %v382_v24, %v381_v8  ;;  %v343_v33 = vsel %vm239_vm7, %v86_v17, 0.0  ;;  %v152_v55 = vld [vmem:[%s2082_s0 + $0x418] sm:$0xff]  ;;  %v173_v8 = vld [vmem:[%s2082_s0 + $0x4c0] sm:$0xff] }
  0x6a   :  { %v299_v9 = vadd.f32 %v298_v10, %v297_v49  ;;  %v345_v34 = vsel %vm239_vm7, %v89_v22, 0.0  ;;  %v386_v38 = vsel %vm239_vm7, %v104_v48, 0.0  ;;  %v388_v52 = vsel %vm239_vm7, %v107_v18, 0.0  ;;  %v167_v48 = vld [vmem:[%s2082_s0 + $0x490] sm:$0xff]  ;;  %v170_v49 = vld [vmem:[%s2082_s0 + $0x4a8] sm:$0xff] }
  0x6b   :  { %v257_v32 = vrot.slane %v256_v19, 2  ;;  %v342_v41 = vadd.f32 %v341_v23, %v340_v27  ;;  %v385_v35 = vadd.f32 %v384_v25, %v383_v28  ;;  %v428_v31 = vsel %vm239_vm7, %v119_v26, 0.0 }
  0x6c   :  { %v301_v30 = vadd.f32 %v300_v14, %v299_v9  ;;  %v429_v39 = vsel %vm239_vm7, %v122_v20, 0.0  ;;  %v431_v56 = vsel %vm239_vm7, %v125_v21, 0.0  ;;  %v347_v58 = vsel %vm239_vm7, %v92_v40, 0.0  ;;  %v155_v14 = vld [vmem:[%s2082_s0 + $0x430] sm:$0xff]  ;;  %v158_v21 = vld [vmem:[%s2082_s0 + $0x448] sm:$0xff]  ;;  %v161_v9 = vld [vmem:[%s2082_s0 + $0x460] sm:$0xff] }
  0x6d   :  { %v258_v53 = vadd.f32 %v257_v32, %v256_v19  ;;  %v344_v43 = vadd.f32 %v343_v33, %v342_v41  ;;  %v387_v45 = vadd.f32 %v386_v38, %v385_v35  ;;  %v430_v46 = vadd.f32 %v429_v39, %v428_v31  ;;  %v176_v38 = vld [vmem:[%s2082_s0 + $0x4d8] sm:$0xff]  ;;  %v179_v31 = vld [vmem:[%s2082_s0 + $0x4f0] sm:$0xff] }
  0x6e   :  { %v302_v42 = vrot.slane %v301_v30, 4  ;;  %v390_v59 = vsel %vm239_vm7, %v110_v50, 0.0  ;;  %v433_v60 = vsel %vm239_vm7, %v128_v51, 0.0  ;;  %v392_v54 = vsel %vm239_vm7, %v113_v11, 0.0  ;;  %v191_v39 = vld [vmem:[%s2082_s0 + $0x550] sm:$0xff] }
  0x6f   :  { %v259_v57 = vrot.slane %v258_v53, 1  ;;  %v346_v0 = vadd.f32 %v345_v34, %v344_v43  ;;  %v389_v5 = vadd.f32 %v388_v52, %v387_v45  ;;  %v432_v1 = vadd.f32 %v431_v56, %v430_v46  ;;  %v164_v34 = vld [vmem:[%s2082_s0 + $0x478] sm:$0xff]  ;;  %v197_v43 = vld [vmem:[%s2082_s0 + $0x580] sm:$0xff] }
  0x70   :  { %v303_v63 = vadd.f32 %v302_v42, %v301_v30  ;;  %v394_v6 = vsel %vm239_vm7, %v116_v36, 0.0  ;;  %v435_v7 = vsel %vm239_vm7, %v131_v12, 0.0  ;;  %v475_v10 = vsel %vm239_vm7, %v143_v47, 0.0  ;;  %v194_v42 = vld [vmem:[%s2082_s0 + $0x568] sm:$0xff] }
  0x71   :  { %v348_v37 = vadd.f32 %v347_v58, %v346_v0  ;;  %v391_v44 = vadd.f32 %v390_v59, %v389_v5  ;;  %v434_v13 = vadd.f32 %v433_v60, %v432_v1  ;;  %v1975_v15 = vadd.f32 %v259_v57, %v258_v53  ;;  %v182_v58 = vld [vmem:[%s2082_s0 + $0x508] sm:$0xff] }
  0x72   :  { %v304_v16 = vrot.slane %v303_v63, 2  ;;  %v437_v17 = vsel %vm239_vm7, %v134_v61, 0.0  ;;  %v476_v22 = vsel %vm239_vm7, %v146_v62, 0.0  ;;  %v478_v19 = vsel %vm239_vm7, %v149_v2, 0.0 }
  0x73   :  { %v349_v29 = vrot.slane %v348_v37, 4  ;;  %v393_v23 = vadd.f32 %v392_v54, %v391_v44  ;;  %v436_v18 = vadd.f32 %v435_v7, %v434_v13  ;;  %v439_v24 = vsel %vm239_vm7, %v137_v3, 0.0  ;;  %v185_v54 = vld [vmem:[%s2082_s0 + $0x520] sm:$0xff] }
  0x74   :  { %v441_v25 = vsel %vm239_vm7, %v140_v4, 0.0  ;;  %v477_v26 = vadd.f32 %v476_v22, %v475_v10  ;;  %v480_v20 = vsel %vm239_vm7, %v152_v55, 0.0  ;;  %v482_v33 = vsel %vm239_vm7, %v155_v14, 0.0  ;;  %v203_v55 = vld [vmem:[%s2082_s0 + $0x5b0] sm:$0xff]  ;;  %v188_v14 = vld [vmem:[%s2082_s0 + $0x538] sm:$0xff] }
  0x75   :  { %v350_v27 = vadd.f32 %v349_v29, %v348_v37  ;;  %v395_v28 = vadd.f32 %v394_v6, %v393_v23  ;;  %v438_v32 = vadd.f32 %v437_v17, %v436_v18  ;;  %v305_v40 = vadd.f32 %v304_v16, %v303_v63  ;;  %v200_v63 = vld [vmem:[%s2082_s0 + $0x598] sm:$0xff] }
  0x76   :  { %v479_v50 = vadd.f32 %v478_v19, %v477_v26  ;;  %v522_v51 = vsel %vm239_vm7, %v167_v48, 0.0  ;;  %v523_v30 = vsel %vm239_vm7, %v170_v49, 0.0  ;;  %v525_v53 = vsel %vm239_vm7, %v173_v8, 0.0  ;;  %v206_v49 = vld [vmem:[%s2082_s0 + $0x5c8] sm:$0xff]  ;;  %v209_v26 = vld [vmem:[%s2082_s0 + $0x5e0] sm:$0xff] }
  0x77   :  { %v351_v41 = vrot.slane %v350_v27, 2  ;;  %v396_v35 = vrot.slane %v395_v28, 4  ;;  %v440_v52 = vadd.f32 %v439_v24, %v438_v32  ;;  %v484_v11 = vsel %vm239_vm7, %v158_v21, 0.0 }
  0x78   :  { %v481_v56 = vadd.f32 %v480_v20, %v479_v50  ;;  %v486_v36 = vsel %vm239_vm7, %v161_v9, 0.0  ;;  %v524_v12 = vadd.f32 %v523_v30, %v522_v51  ;;  %v488_v47 = vsel %vm239_vm7, %v164_v34, 0.0 }
  0x79   :  { %v397_v45 = vadd.f32 %v396_v35, %v395_v28  ;;  %v442_v46 = vadd.f32 %v441_v25, %v440_v52  ;;  %v527_v57 = vsel %vm239_vm7, %v176_v38, 0.0  ;;  %v306_v59 = vrot.slane %v305_v40, 1  ;;  %v212_v38 = vld [vmem:[%s2082_s0 + $0x5f8] sm:$0xff] }
  0x7a   :  { %v352_v60 = vadd.f32 %v351_v41, %v350_v27  ;;  %v483_v61 = vadd.f32 %v482_v33, %v481_v56  ;;  %v526_v62 = vadd.f32 %v525_v53, %v524_v12  ;;  %v529_v1 = vsel %vm239_vm7, %v179_v31, 0.0 }
  0x7b   :  { %v398_v0 = vrot.slane %v397_v45, 2  ;;  %v443_v5 = vrot.slane %v442_v46, 4  ;;  %v569_v2 = vsel %vm239_vm7, %v191_v39, 0.0  ;;  %v570_v3 = vsel %vm239_vm7, %v194_v42, 0.0 }
  0x7c   :  { %v485_v6 = vadd.f32 %v484_v11, %v483_v61  ;;  %v528_v7 = vadd.f32 %v527_v57, %v526_v62  ;;  %v572_v4 = vsel %vm239_vm7, %v197_v43, 0.0  ;;  %v531_v13 = vsel %vm239_vm7, %v182_v58, 0.0 }
  0x7d   :  { %v399_v37 = vadd.f32 %v398_v0, %v397_v45  ;;  %v444_v44 = vadd.f32 %v443_v5, %v442_v46  ;;  %v571_v10 = vadd.f32 %v570_v3, %v569_v2  ;;  %v353_v16 = vrot.slane %v352_v60, 1 }
  0x7e   :  { %v487_v17 = vadd.f32 %v486_v36, %v485_v6  ;;  %v530_v22 = vadd.f32 %v529_v1, %v528_v7  ;;  %v574_v48 = vsel %vm239_vm7, %v200_v63, 0.0  ;;  %v307_v29 = vadd.f32 %v306_v59, %v305_v40 }
  0x7f   :  { %v445_v23 = vrot.slane %v444_v44, 2  ;;  %v533_v18 = vsel %vm239_vm7, %v185_v54, 0.0  ;;  %v573_v19 = vadd.f32 %v572_v4, %v571_v10  ;;  %v576_v25 = vsel %vm239_vm7, %v203_v55, 0.0 }
  0x80   :  { %v489_v8 = vadd.f32 %v488_v47, %v487_v17  ;;  %v532_v24 = vadd.f32 %v531_v13, %v530_v22  ;;  %v400_v20 = vrot.slane %v399_v37, 1  ;;  %v535_v9 = vsel %vm239_vm7, %v188_v14, 0.0 }
  0x81   :  { %v446_v21 = vadd.f32 %v445_v23, %v444_v44  ;;  %v575_v27 = vadd.f32 %v574_v48, %v573_v19  ;;  %v354_v28 = vadd.f32 %v353_v16, %v352_v60  ;;  %v578_v34 = vsel %vm239_vm7, %v206_v49, 0.0 }
  0x82   :  { %v490_v32 = vrot.slane %v489_v8, 4  ;;  %v534_v33 = vadd.f32 %v533_v18, %v532_v24  ;;  %v593_v50 = vmul.f32 0.015625, %v1975_v15  ;;  %v596_v51 = vmul.f32 0.015625, %v307_v29  ;;  %v695_v29 = vld [vmem:[%s2083_s2] sm:$0x3] }
  0x83   :  { %v577_v40 = vadd.f32 %v576_v25, %v575_v27  ;;  %v447_v30 = vrot.slane %v446_v21, 1  ;;  %v580_v52 = vsel %vm239_vm7, %v209_v26, 0.0  ;;  %v401_v53 = vadd.f32 %v400_v20, %v399_v37  ;;  %v907_v25 = vld [vmem:[%s2084_s3] sm:$0x3] }
  0x84   :  { %v491_v41 = vadd.f32 %v490_v32, %v489_v8  ;;  %v536_v35 = vadd.f32 %v535_v9, %v534_v33  ;;  %v582_v11 = vsel %vm239_vm7, %v212_v38, 0.0  ;;  %v599_v36 = vmul.f32 0.015625, %v354_v28 }
  0x85   :  { %v579_v31 = vadd.f32 %v578_v34, %v577_v40  ;;  %v752_v42 = vsel %vm731_vm0, %v596_v51, %v593_v50  ;;  %v448_v43 = vadd.f32 %v447_v30, %v446_v21  ;;  %v602_v47 = vmul.f32 0.015625, %v401_v53 }
  0x86   :  { %v492_v39 = vrot.slane %v491_v41, 2  ;;  %v537_v56 = vrot.slane %v536_v35, 4  ;;  %v753_v59 = vsel %vm733_vm1, %v599_v36, %v752_v42  ;;  %v697_v22 = vlaneseq }
  0x87   :  { %v581_v12 = vadd.f32 %v580_v52, %v579_v31  ;;  %v605_v63 = vmul.f32 0.015625, %v448_v43  ;;  %v754_v5 = vsel %vm735_vm2, %v602_v47, %v753_v59  ;;  %v925_v50 = vstv %s2085_s4 }
  0x88   :  { %v493_v45 = vadd.f32 %v492_v39, %v491_v41  ;;  %v538_v46 = vadd.f32 %v537_v56, %v536_v35  ;;  %v698_v48 = vshrl.u32 %v697_v22, 7 }
  0x89   :  { %v583_v15 = vadd.f32 %v582_v11, %v581_v12  ;;  %v755_v7 = vsel %vm737_vm3, %v605_v63, %v754_v5 }
  0x8a   :  { %v494_v57 = vrot.slane %v493_v45, 1  ;;  %v539_v58 = vrot.slane %v538_v46, 2  ;;  %v699_v49 = vsub.s32 0, %v698_v48  ;;  %v703_v23 = vsub.s32 1, %v698_v48 }
  0x8b   :  { %v584_v60 = vrot.slane %v583_v15, 4 }
  0x8c   :  { %v495_v61 = vadd.f32 %v494_v57, %v493_v45  ;;  %v540_v62 = vadd.f32 %v539_v58, %v538_v46  ;;  %v700_v18 = vrot.slane %v695_v29, %v699_v49  ;;  %v704_v19 = vrot.slane %v695_v29, %v703_v23 }
  0x8d   :  { %v585_v0 = vadd.f32 %v584_v60, %v583_v15  ;;  %v912_v9 = vrot.slane %v907_v25, %v699_v49  ;;  %v916_v28 = vrot.slane %v907_v25, %v703_v23 }
  0x8e   :  { %v541_v1 = vrot.slane %v540_v62, 1  ;;  %v608_v54 = vmul.f32 0.015625, %v495_v61 }
  0x8f   :  { %v586_v2 = vrot.slane %v585_v0, 2 }
  0x90   :  { %v542_v6 = vadd.f32 %v541_v1, %v540_v62  ;;  %v756_v37 = vsel %vm739_vm4, %v608_v54, %v755_v7 }
  0x91   :  { %v587_v3 = vadd.f32 %v586_v2, %v585_v0 }
  0x92   :  { %v611_v4 = vmul.f32 0.015625, %v542_v6 }
  0x93   :  { %v588_v55 = vrot.slane %v587_v3, 1 }
  0x94   :  { %v757_v13 = vsel %vm741_vm5, %v611_v4, %v756_v37 }
  0x95   :  { %v589_v44 = vadd.f32 %v588_v55, %v587_v3 }
  0x97   :  { %v614_v10 = vmul.f32 0.015625, %v589_v44 }
  0x99   :  { %v758_v14 = vsel %vm743_vm6, %v614_v10, %v757_v13 }
  0x9a   :  { %933 = vmatmul.mubr.msk.f32.vlgmr.msra.gmra.mrb[0].mxu0 %vm239_vm7, %v758_v14 }
 0x13c   :  { %v829_v16 = vpop.f32.mrb[0].mxu1 }
 0x13d   :  { %v831_v17 = vpop.f32.mrb[1].mxu1  ;;  %v830_v8 = vadd.f32 %v829_v16, %v700_v18 }
 0x13e   :  { %v832_v24 = vadd.f32 %v831_v17, %v704_v19 }
 0x16d   :  { %v900_v26 = vpop.f32.mrb[0].mxu0 }
 0x16e   :  { %v901_v20 = vadd.f32 %v900_v26, %v830_v8  ;;  %v902_v21 = vpop.f32.mrb[1].mxu0 }
 0x16f   :  { %v903_v27 = vadd.f32 %v902_v21, %v832_v24 }
 0x170   :  { %v905_v32 = vmax.f32 %v901_v20, 0.0 }
 0x171   :  { %v906_v33 = vmax.f32 %v903_v27, 0.0 }
 0x172   :  { %v919_v34 = vmul.f32 %v912_v9, %v905_v32 }
 0x173   :  { %v920_v38 = vmul.f32 %v916_v28, %v906_v33 }
 0x175   :  { %v921_v40 = vadd.f32 %v920_v38, %v919_v34 }
 0x177   :  { %922 = vadd.xlane.f32.xlu0 %v921_v40 }
 0x204   :  { %v923_v51 = vpop.xlane.xlu0 %922 }
 0x205   :  { %v926_v30 = vadd.f32 %v925_v50, %v923_v51 }
 0x207   :  { %928 = vst.msk [vmem:[%s2086_s5] sm:$0xff] %vm927_vm8, %v926_v30 }

</bundles_post_ra>
